<compile_context>
chip_gen: v7x
topology: tpu7x:2x2x1
jax: 0.10.0
libtpu: 0.0.40
codegen_flags: <defaults>
</compile_context>

<pallas_src>
import functools

import jax
import jax.numpy as jnp
from jax.experimental import pallas as pl
from jax.experimental.pallas import tpu as pltpu


def _tcn_merge_kernel(x_ref, w1_ref, b1_ref, w2_ref, b2_ref,
                      wr_ref, br_ref, wl_ref, bl_ref, out_ref):
    x = x_ref[...]                                            # (tn, F) bf16

    # conv1 (block-banded: all K output positions feeding the last step,
    # already laid out as (tn, K*H) for conv2) -> one MXU matmul
    h1 = jnp.dot(x, w1_ref[...], preferred_element_type=jnp.float32)
    h1 = jnp.maximum(h1 + b1_ref[...], 0.0)                   # relu1; dropout=id

    # conv2 at the last timestep: single matmul, contraction K*H
    h2 = jnp.dot(h1.astype(jnp.bfloat16), w2_ref[...],
                 preferred_element_type=jnp.float32)
    h2 = jnp.maximum(h2 + b2_ref[...], 0.0)                   # relu2; dropout=id

    # residual at the last timestep (zero-padded weight -> no in-kernel slicing)
    res = jnp.dot(x, wr_ref[...], preferred_element_type=jnp.float32) + br_ref[...]
    y = jnp.maximum(h2 + res, 0.0)                            # block output ReLU

    # Linear head (lane-padded to 128) + log_softmax (padded lanes ~ -1e30)
    logits = jnp.dot(y.astype(jnp.bfloat16), wl_ref[...],
                     preferred_element_type=jnp.float32) + bl_ref[...]
    m = jnp.max(logits, axis=1, keepdims=True)
    z = logits - m
    lse = jnp.log(jnp.sum(jnp.exp(z), axis=1, keepdims=True))
    out_ref[...] = z - lse


def _round_up(a, b):
    return ((a + b - 1) // b) * b


def tcn_merge_forward(x_ncl, params, *, kernel_size=3, dilation=1):
    """x_ncl: (N, C_in, L) float32, PyTorch Conv1d layout. Returns (N, O) log-probs."""
    w1, b1, w2, b2, wd, bd, wl, bl = params
    N, Cin, L = x_ncl.shape
    K = kernel_size
    H = w1.shape[2]
    O = wl.shape[1]
    OP = 128                                   # lane-dense padded class dim
    downsample = (Cin != H)
    T = 2 * K - 1
    F = T * Cin

    # Only the receptive field of the final output timestep matters:
    # 2*(K-1)*d + 1 input steps, of which only every d-th (2K-1 total) is used.
    rf = 2 * (K - 1) * dilation + 1
    if L >= rf:
        window = x_ncl[:, :, L - rf:]
    else:                                      # causal zero pad
        window = jnp.pad(x_ncl, ((0, 0), (0, 0), (rf - L, 0)))
    xw = jnp.transpose(window[:, :, ::dilation], (0, 2, 1))    # (N, T, Cin)
    x2d = xw.reshape(N, F).astype(jnp.bfloat16)                # (N, F)

    # Batch tiling: always a cdiv grid; tile multiple-of-8, capped at 2048 so
    # large batches get double-buffering + megacore sharding and v7x VMEM fits.
    tn = min(2048, _round_up(N, 8))
    Np = _round_up(N, tn)
    if Np != N:
        x2d = jnp.pad(x2d, ((0, Np - N), (0, 0)))

    # ---- wrapper-side weight prep (kernel does zero slicing / reshaping) ----
    # Block-banded conv1 weight: W1b[j*Cin+c, m*H+h] = w1[j-m, c, h] for
    # 0 <= j-m < K, else 0  (m = conv1 output position index, oldest-first).
    w1b = jnp.zeros((F, K * H), jnp.float32)
    for m in range(K):
        for k in range(K):
            j = m + k
            w1b = w1b.at[j * Cin:(j + 1) * Cin, m * H:(m + 1) * H].set(w1[k])
    w1b = w1b.astype(jnp.bfloat16)
    b1b = jnp.tile(b1.astype(jnp.float32), (1, K))             # (1, K*H)

    w2f = w2.reshape(K * H, H).astype(jnp.bfloat16)
    b2f = b2.astype(jnp.float32)

    # Residual (1x1 downsample, or identity when Cin == H) folded into a
    # zero-padded (F, H) weight that only reads the last window position.
    wr = jnp.zeros((F, H), jnp.float32)
    if downsample:
        wr = wr.at[(T - 1) * Cin:, :].set(wd)
        br = bd.astype(jnp.float32)
    else:
        wr = wr.at[(T - 1) * Cin:, :].set(jnp.eye(Cin, H, dtype=jnp.float32))
        br = jnp.zeros((1, H), jnp.float32)
    wr = wr.astype(jnp.bfloat16)

    # Lane-dense head: zero weight columns + -1e30 bias on padded lanes keep
    # log_softmax exact for the real O classes; output store is unmasked.
    wlp = jnp.zeros((H, OP), jnp.float32).at[:, :O].set(wl).astype(jnp.bfloat16)
    blp = jnp.full((1, OP), -1e30, jnp.float32).at[:, :O].set(bl.astype(jnp.float32))

    grid = (Np // tn,)

    def wspec(a):
        return pl.BlockSpec(a.shape, lambda i: (0, 0))

    mm_flops = F * K * H + K * H * H + F * H + H * OP
    cost = pl.CostEstimate(
        flops=2 * Np * mm_flops,
        transcendentals=Np * (OP + 1),
        bytes_accessed=Np * (F * 2 + OP * 4) + 2 * mm_flops)

    out = pl.pallas_call(
        _tcn_merge_kernel,
        out_shape=jax.ShapeDtypeStruct((Np, OP), jnp.float32),
        grid=grid,
        in_specs=[pl.BlockSpec((tn, F), lambda i: (i, 0)),
                  wspec(w1b), wspec(b1b), wspec(w2f), wspec(b2f),
                  wspec(wr), wspec(br), wspec(wlp), wspec(blp)],
        out_specs=pl.BlockSpec((tn, OP), lambda i: (i, 0)),
        compiler_params=pltpu.CompilerParams(
            dimension_semantics=("parallel",)),
        cost_estimate=cost,
    )(x2d, w1b, b1b, w2f, b2f, wr, br, wlp, blp)

    return out[:N, :O]


def init_params(key, input_size, hidden_size, output_size, kernel_size):
    ks = jax.random.split(key, 8)
    s = 0.1
    w1 = s * jax.random.normal(ks[0], (kernel_size, input_size, hidden_size), jnp.float32)
    b1 = s * jax.random.normal(ks[1], (1, hidden_size), jnp.float32)
    w2 = s * jax.random.normal(ks[2], (kernel_size, hidden_size, hidden_size), jnp.float32)
    b2 = s * jax.random.normal(ks[3], (1, hidden_size), jnp.float32)
    wd = s * jax.random.normal(ks[4], (input_size, hidden_size), jnp.float32)
    bd = s * jax.random.normal(ks[5], (1, hidden_size), jnp.float32)
    wl = s * jax.random.normal(ks[6], (hidden_size, output_size), jnp.float32)
    bl = s * jax.random.normal(ks[7], (1, output_size), jnp.float32)
    return (w1, b1, w2, b2, wd, bd, wl, bl)


if __name__ == "__main__":
    # small shapes: batch=2, input_size=4 channels, seq_len=16,
    # hidden_size=32, output_size=10, kernel_size=3
    N, Cin, L = 2, 4, 16
    H, O, K = 32, 10, 3

    key = jax.random.PRNGKey(0)
    k_x, k_p = jax.random.split(key)
    x = jax.random.normal(k_x, (N, Cin, L), jnp.float32)
    params = init_params(k_p, Cin, H, O, K)

    logp = jax.jit(functools.partial(tcn_merge_forward,
                                     kernel_size=K, dilation=1))(x, params)
    logp = jax.block_until_ready(logp)

    assert logp.shape == (N, O)
    assert bool(jnp.all(jnp.isfinite(logp)))
    # log_softmax rows must exponentiate-sum to ~1
    assert bool(jnp.allclose(jnp.sum(jnp.exp(logp), axis=1), 1.0, atol=1e-5))
    print("KERNEL_OK")
</pallas_src>

<mosaic_0001>
module attributes {stable_mosaic.version = 11 : i64} {
  func.func @_tcn_merge_kernel(%arg0: i32, %arg1: memref<8x20xbf16, #tpu.memory_space<vmem>>, %arg2: memref<20x96xbf16, #tpu.memory_space<vmem>>, %arg3: memref<1x96xf32, #tpu.memory_space<vmem>>, %arg4: memref<96x32xbf16, #tpu.memory_space<vmem>>, %arg5: memref<1x32xf32, #tpu.memory_space<vmem>>, %arg6: memref<20x32xbf16, #tpu.memory_space<vmem>>, %arg7: memref<1x32xf32, #tpu.memory_space<vmem>>, %arg8: memref<32x128xbf16, #tpu.memory_space<vmem>>, %arg9: memref<1x128xf32, #tpu.memory_space<vmem>>, %arg10: memref<8x128xf32, #tpu.memory_space<vmem>>) attributes {dimension_semantics = [#tpu.dimension_semantics<parallel>], iteration_bounds = array<i64: 1>, scalar_prefetch = 0 : i64, scratch_operands = 0 : i64, tpu.core_type = #tpu.core_type<tc>, window_params = [{transform_indices = @transform_0, window_bounds = array<i64: 8, 20>}, {pipeline_mode = #tpu.pipeline_mode<synchronous>, transform_indices = @transform_1, window_bounds = array<i64: 20, 96>}, {pipeline_mode = #tpu.pipeline_mode<synchronous>, transform_indices = @transform_2, window_bounds = array<i64: 1, 96>}, {pipeline_mode = #tpu.pipeline_mode<synchronous>, transform_indices = @transform_3, window_bounds = array<i64: 96, 32>}, {pipeline_mode = #tpu.pipeline_mode<synchronous>, transform_indices = @transform_4, window_bounds = array<i64: 1, 32>}, {pipeline_mode = #tpu.pipeline_mode<synchronous>, transform_indices = @transform_5, window_bounds = array<i64: 20, 32>}, {pipeline_mode = #tpu.pipeline_mode<synchronous>, transform_indices = @transform_6, window_bounds = array<i64: 1, 32>}, {pipeline_mode = #tpu.pipeline_mode<synchronous>, transform_indices = @transform_7, window_bounds = array<i64: 32, 128>}, {pipeline_mode = #tpu.pipeline_mode<synchronous>, transform_indices = @transform_8, window_bounds = array<i64: 1, 128>}, {transform_indices = @transform_9, window_bounds = array<i64: 8, 128>}]} {
    %c0 = arith.constant 0 : index
    %c0_0 = arith.constant 0 : index
    %0 = vector.load %arg1[%c0, %c0_0] : memref<8x20xbf16, #tpu.memory_space<vmem>>, vector<8x20xbf16>
    %c0_1 = arith.constant 0 : index
    %c0_2 = arith.constant 0 : index
    %1 = vector.load %arg2[%c0_1, %c0_2] : memref<20x96xbf16, #tpu.memory_space<vmem>>, vector<20x96xbf16>
    %cst = arith.constant dense<0.000000e+00> : vector<8x96xf32>
    %2 = tpu.matmul %0, %1, %cst {dimension_numbers = #tpu.dot_dimension_numbers<[1], [0], [0], [1], [0, 0, 1, 1], [], []>} : vector<8x20xbf16>, vector<20x96xbf16>, vector<8x96xf32> -> vector<8x96xf32>
    %c0_3 = arith.constant 0 : index
    %c0_4 = arith.constant 0 : index
    %3 = vector.load %arg3[%c0_3, %c0_4] : memref<1x96xf32, #tpu.memory_space<vmem>>, vector<1x96xf32>
    %4 = vector.broadcast %3 : vector<1x96xf32> to vector<8x96xf32>
    %5 = arith.addf %2, %4 : vector<8x96xf32>
    %cst_5 = arith.constant 0.000000e+00 : f32
    %6 = vector.broadcast %cst_5 : f32 to vector<8x96xf32>
    %7 = arith.maximumf %5, %6 : vector<8x96xf32>
    %8 = arith.truncf %7 : vector<8x96xf32> to vector<8x96xbf16>
    %c0_6 = arith.constant 0 : index
    %c0_7 = arith.constant 0 : index
    %9 = vector.load %arg4[%c0_6, %c0_7] : memref<96x32xbf16, #tpu.memory_space<vmem>>, vector<96x32xbf16>
    %cst_8 = arith.constant dense<0.000000e+00> : vector<8x32xf32>
    %10 = tpu.matmul %8, %9, %cst_8 {dimension_numbers = #tpu.dot_dimension_numbers<[1], [0], [0], [1], [0, 0, 1, 1], [], []>} : vector<8x96xbf16>, vector<96x32xbf16>, vector<8x32xf32> -> vector<8x32xf32>
    %c0_9 = arith.constant 0 : index
    %c0_10 = arith.constant 0 : index
    %11 = vector.load %arg5[%c0_9, %c0_10] : memref<1x32xf32, #tpu.memory_space<vmem>>, vector<1x32xf32>
    %12 = vector.broadcast %11 : vector<1x32xf32> to vector<8x32xf32>
    %13 = arith.addf %10, %12 : vector<8x32xf32>
    %cst_11 = arith.constant 0.000000e+00 : f32
    %14 = vector.broadcast %cst_11 : f32 to vector<8x32xf32>
    %15 = arith.maximumf %13, %14 : vector<8x32xf32>
    %c0_12 = arith.constant 0 : index
    %c0_13 = arith.constant 0 : index
    %16 = vector.load %arg6[%c0_12, %c0_13] : memref<20x32xbf16, #tpu.memory_space<vmem>>, vector<20x32xbf16>
    %cst_14 = arith.constant dense<0.000000e+00> : vector<8x32xf32>
    %17 = tpu.matmul %0, %16, %cst_14 {dimension_numbers = #tpu.dot_dimension_numbers<[1], [0], [0], [1], [0, 0, 1, 1], [], []>} : vector<8x20xbf16>, vector<20x32xbf16>, vector<8x32xf32> -> vector<8x32xf32>
    %c0_15 = arith.constant 0 : index
    %c0_16 = arith.constant 0 : index
    %18 = vector.load %arg7[%c0_15, %c0_16] : memref<1x32xf32, #tpu.memory_space<vmem>>, vector<1x32xf32>
    %19 = vector.broadcast %18 : vector<1x32xf32> to vector<8x32xf32>
    %20 = arith.addf %17, %19 : vector<8x32xf32>
    %21 = arith.addf %15, %20 : vector<8x32xf32>
    %cst_17 = arith.constant 0.000000e+00 : f32
    %22 = vector.broadcast %cst_17 : f32 to vector<8x32xf32>
    %23 = arith.maximumf %21, %22 : vector<8x32xf32>
    %24 = arith.truncf %23 : vector<8x32xf32> to vector<8x32xbf16>
    %c0_18 = arith.constant 0 : index
    %c0_19 = arith.constant 0 : index
    %25 = vector.load %arg8[%c0_18, %c0_19] : memref<32x128xbf16, #tpu.memory_space<vmem>>, vector<32x128xbf16>
    %cst_20 = arith.constant dense<0.000000e+00> : vector<8x128xf32>
    %26 = tpu.matmul %24, %25, %cst_20 {dimension_numbers = #tpu.dot_dimension_numbers<[1], [0], [0], [1], [0, 0, 1, 1], [], []>} : vector<8x32xbf16>, vector<32x128xbf16>, vector<8x128xf32> -> vector<8x128xf32>
    %c0_21 = arith.constant 0 : index
    %c0_22 = arith.constant 0 : index
    %27 = vector.load %arg9[%c0_21, %c0_22] : memref<1x128xf32, #tpu.memory_space<vmem>>, vector<1x128xf32>
    %28 = vector.broadcast %27 : vector<1x128xf32> to vector<8x128xf32>
    %29 = arith.addf %26, %28 : vector<8x128xf32>
    %cst_23 = arith.constant dense<0xFF800000> : vector<8xf32>
    %30 = vector.multi_reduction <maximumf>, %29, %cst_23 [1] : vector<8x128xf32> to vector<8xf32>
    %31 = vector.shape_cast %30 : vector<8xf32> to vector<8x1xf32>
    %32 = vector.broadcast %31 : vector<8x1xf32> to vector<8x128xf32>
    %33 = arith.subf %29, %32 : vector<8x128xf32>
    %34 = math.exp %33 : vector<8x128xf32>
    %cst_24 = arith.constant dense<0.000000e+00> : vector<8xf32>
    %35 = vector.multi_reduction <add>, %34, %cst_24 [1] : vector<8x128xf32> to vector<8xf32>
    %36 = vector.shape_cast %35 : vector<8xf32> to vector<8x1xf32>
    %37 = math.log %36 : vector<8x1xf32>
    %38 = vector.broadcast %37 : vector<8x1xf32> to vector<8x128xf32>
    %39 = arith.subf %33, %38 : vector<8x128xf32>
    %c0_25 = arith.constant 0 : index
    %c0_26 = arith.constant 0 : index
    %40 = vector.load %arg10[%c0_25, %c0_26] : memref<8x128xf32, #tpu.memory_space<vmem>>, vector<8x128xf32>
    tpu.vector_store %arg10[%c0_25, %c0_26], %39 {strides = array<i32>} : memref<8x128xf32, #tpu.memory_space<vmem>>, vector<8x128xf32>,
    return
  }
  func.func @transform_0(%arg0: i32) -> (i32, i32) {
    %c0_i32 = arith.constant 0 : i32
    %c0_i32_0 = arith.constant 0 : i32
    return %arg0, %c0_i32 : i32, i32
  }
  func.func @transform_1(%arg0: i32) -> (i32, i32) {
    %c0_i32 = arith.constant 0 : i32
    %c0_i32_0 = arith.constant 0 : i32
    %c0_i32_1 = arith.constant 0 : i32
    return %c0_i32, %c0_i32_0 : i32, i32
  }
  func.func @transform_2(%arg0: i32) -> (i32, i32) {
    %c0_i32 = arith.constant 0 : i32
    %c0_i32_0 = arith.constant 0 : i32
    %c0_i32_1 = arith.constant 0 : i32
    return %c0_i32, %c0_i32_0 : i32, i32
  }
  func.func @transform_3(%arg0: i32) -> (i32, i32) {
    %c0_i32 = arith.constant 0 : i32
    %c0_i32_0 = arith.constant 0 : i32
    %c0_i32_1 = arith.constant 0 : i32
    return %c0_i32, %c0_i32_0 : i32, i32
  }
  func.func @transform_4(%arg0: i32) -> (i32, i32) {
    %c0_i32 = arith.constant 0 : i32
    %c0_i32_0 = arith.constant 0 : i32
    %c0_i32_1 = arith.constant 0 : i32
    return %c0_i32, %c0_i32_0 : i32, i32
  }
  func.func @transform_5(%arg0: i32) -> (i32, i32) {
    %c0_i32 = arith.constant 0 : i32
    %c0_i32_0 = arith.constant 0 : i32
    %c0_i32_1 = arith.constant 0 : i32
    return %c0_i32, %c0_i32_0 : i32, i32
  }
  func.func @transform_6(%arg0: i32) -> (i32, i32) {
    %c0_i32 = arith.constant 0 : i32
    %c0_i32_0 = arith.constant 0 : i32
    %c0_i32_1 = arith.constant 0 : i32
    return %c0_i32, %c0_i32_0 : i32, i32
  }
  func.func @transform_7(%arg0: i32) -> (i32, i32) {
    %c0_i32 = arith.constant 0 : i32
    %c0_i32_0 = arith.constant 0 : i32
    %c0_i32_1 = arith.constant 0 : i32
    return %c0_i32, %c0_i32_0 : i32, i32
  }
  func.func @transform_8(%arg0: i32) -> (i32, i32) {
    %c0_i32 = arith.constant 0 : i32
    %c0_i32_0 = arith.constant 0 : i32
    %c0_i32_1 = arith.constant 0 : i32
    return %c0_i32, %c0_i32_0 : i32, i32
  }
  func.func @transform_9(%arg0: i32) -> (i32, i32) {
    %c0_i32 = arith.constant 0 : i32
    %c0_i32_0 = arith.constant 0 : i32
    return %arg0, %c0_i32 : i32, i32
  }
}

</mosaic_0001>

<bundles_post_ra>
// kernel: tcn_merge_forward.1
= control target key start
LH: loop header
LB: loop body
LE: loop exit
PB: predicated region body
PF: predicated region fallthrough
CT: control target
= control target key end

     0   :  { %v444_v0 = vmov 0.0   ;;  %vm57_vm0 = vcmask 1041408   ;;  %vm445_vm1 = vmmov 0   ;;  %vm53_vm2 = vcmask 162816   ;;  %s574_s1 = inlined_call_operand.vmem [shape: bf16[20,96], index: 1, kind: input, shape index: {}]   ;;  %s575_s3 = inlined_call_operand.vmem [shape: bf16[96,32], index: 3, kind: input, shape index: {}]   ;;  %s576_s0 = inlined_call_operand.vmem [shape: bf16[8,20], index: 0, kind: input, shape index: {}]   ;;  %s577_s5 = inlined_call_operand.vmem [shape: bf16[20,32], index: 5, kind: input, shape index: {}]   ;;  %s578_s2 = inlined_call_operand.vmem [shape: f32[1,96], index: 2, kind: input, shape index: {}]   ;;  %s579_s7 = inlined_call_operand.vmem [shape: bf16[32,128], index: 7, kind: input, shape index: {}]   ;;  %s580_s6 = inlined_call_operand.vmem [shape: f32[1,32], index: 6, kind: input, shape index: {}]   ;;  %s581_s4 = inlined_call_operand.vmem [shape: f32[1,32], index: 4, kind: input, shape index: {}]   ;;  %s582_s8 = inlined_call_operand.vmem [shape: f32[1,128], index: 8, kind: input, shape index: {}]   ;;  %s583_s9 = inlined_call_operand.vmem [shape: f32[8,128], index: 9, kind: output, shape index: {}]  }
   0x1   :  { %386 = vmatprep.subr.bf16.mxu0 %v444_v0  ;;  %v428_v1 = vld [vmem:[%s574_s1] sm:$0xff]   ;;  %390 = vmatprep.mubr.msk.bf16.mxu0 %vm445_vm1, %v444_v0  ;;  %v429_v2 = vld [vmem:[%s574_s1 + $0x8] ss:$0 sps:$4 sm:$0x33]   ;;  %v432_v8 = vld [vmem:[%s575_s3 + $0x10] sm:$0xff]   ;;  %vm158_vm3 = vcmask 785408  }
   0x2   :  { %394 = vmatprep.subr.bf16.mxu1 %v444_v0  ;;  %v430_v3 = vld [vmem:[%s575_s3] sm:$0xff]   ;;  %406 = vmatprep.mubr.msk.bf16.mxu1 %vm445_vm1, %v444_v0  ;;  %v59_v4 = vsel %vm57_vm0, %v429_v2, 0  ;;  %v431_v5 = vld [vmem:[%s575_s3 + $0x8] sm:$0xff]   ;;  %v433_v9 = vld [vmem:[%s575_s3 + $0x18] sm:$0xff]   ;;  %vm291_vm4 = vcmask 261120  }
   0x3   :  { %387 = vmatpush3.bf16.msra.mxu0 %v428_v1  ;;  %395 = vmatpush3.bf16.msra.mxu1 %v430_v3  ;;  %v33_v6 = vld [vmem:[%s576_s0] sm:$0xf]  ;;  %v436_v11 = vld [vmem:[%s577_s5 + $0x8] ss:$0 sps:$4 sm:$0x33]  }
   0x4   :  { %388 = vmatprep.subr.bf16.mxu0 %v444_v0  ;;  %396 = vmatprep.subr.bf16.mxu1 %v444_v0  ;;  %v434_v7 = vld [vmem:[%s577_s5] sm:$0xff]   ;;  %v223_v12 = vsel %vm57_vm0, %v436_v11, 0  ;;  %v437_v13 = vld [vmem:[%s575_s3 + $0x28] sm:$0xff]  }
   0x5   :  { %v435_v10 = vld [vmem:[%s575_s3 + $0x20] sm:$0xff]   ;;  %v439_v27 = vld [vmem:[%s579_s7 + $0x8] sm:$0xff]  }
   0x6   :  { %v350_v14 = vld [vmem:[%s578_s2] ss:$0 sm:$0xff] }
   0x7   :  { %389 = vmatpush3.bf16.msra.mxu0 %v59_v4  ;;  %397 = vmatpush3.bf16.msra.mxu1 %v431_v5  ;;  %v438_v26 = vld [vmem:[%s579_s7] sm:$0xff]  }
   0x8   :  { %410 = vmatprep.subr.bf16.mxu0 %v444_v0  ;;  %398 = vmatprep.subr.bf16.mxu1 %v444_v0  ;;  %v362_v28 = vld [vmem:[%s580_s6] ss:$0 sm:$0xff] }
   0x9   :  { %v354_v29 = vld [vmem:[%s581_s4] ss:$0 sm:$0xff] }
   0xa   :  { %391 = vmatmul.mubr.msk.bf16.vlgmr.msra.gmra.mrb[0].mxu0 %vm53_vm2, %v33_v6  ;;  %v366_v40 = vld [vmem:[%s582_s8] ss:$0 sm:$0xff] }
   0xb   :  { %411 = vmatpush3.bf16.msra.mxu0 %v434_v7  ;;  %414 = vmatprep.mubr.msk.bf16.mxu0 %vm445_vm1, %v444_v0 }
   0xc   :  { %399 = vmatpush3.bf16.msra.mxu1 %v432_v8  ;;  %412 = vmatprep.subr.bf16.mxu0 %v444_v0 }
   0xd   :  { %400 = vmatprep.subr.bf16.mxu1 %v444_v0 }
   0xf   :  { %413 = vmatpush3.bf16.msra.mxu0 %v223_v12 }
  0x10   :  { %401 = vmatpush3.bf16.msra.mxu1 %v433_v9  ;;  %418 = vmatprep.subr.bf16.mxu0 %v444_v0 }
  0x11   :  { %402 = vmatprep.subr.bf16.mxu1 %v444_v0 }
  0x12   :  { %415 = vmatmul.mubr.msk.bf16.vlgmr.msra.gmra.mrb[4].mxu0 %vm53_vm2, %v33_v6 }
  0x13   :  { %422 = vmatprep.mubr.msk.bf16.mxu0 %vm445_vm1, %v444_v0  ;;  %419 = vmatpush3.bf16.msra.mxu0 %v438_v26 }
  0x14   :  { %403 = vmatpush3.bf16.msra.mxu1 %v435_v10  ;;  %420 = vmatprep.subr.bf16.mxu0 %v444_v0 }
  0x15   :  { %404 = vmatprep.subr.bf16.mxu1 %v444_v0 }
  0x17   :  { %421 = vmatpush3.bf16.msra.mxu0 %v439_v27 }
  0x18   :  { %405 = vmatpush3.bf16.msra.mxu1 %v437_v13 }
  0xdd   :  { %v95_v15 = vpop.f32.mrb[0].mxu0 }
  0xde   :  { %v96_v16 = vadd.f32 %v350_v14, %v95_v15  ;;  %v392_v17 = vpop.f32.mrb[1].mxu0 }
  0xdf   :  { %v98_v18 = vpop.f32.mrb[2].mxu0 }
  0xe0   :  { %v101_v19 = vmax.f32 %v96_v16, 0.0  ;;  %v393_v20 = vpop.f32.mrb[3].mxu0 }
  0xe2   :  { %v102_v21 = vpack.c.bf16 %v101_v19, %v101_v19 }
  0xe4   :  { %407 = vmatmul.mubr.msk.bf16.vlgmr.msra.gmra.mrb[0].mxu1 %vm158_vm3, %v102_v21 }
  0xe5   :  { %v259_v22 = vpop.f32.mrb[4].mxu0 }
  0xe6   :  { %v416_v23 = vpop.f32.mrb[5].mxu0  ;;  %v260_v31 = vadd.f32 %v362_v28, %v259_v22 }
  0xe7   :  { %v262_v24 = vpop.f32.mrb[6].mxu0 }
  0xe8   :  { %v417_v25 = vpop.f32.mrb[7].mxu0 }
 0x1b7   :  { %v196_v30 = vpop.f32.mrb[0].mxu1 }
 0x1b8   :  { %v197_v32 = vadd.f32 %v354_v29, %v196_v30  ;;  %v408_v33 = vpop.f32.mrb[1].mxu1 }
 0x1b9   :  { %v199_v34 = vpop.f32.mrb[2].mxu1 }
 0x1ba   :  { %v202_v35 = vmax.f32 %v197_v32, 0.0  ;;  %v409_v36 = vpop.f32.mrb[3].mxu1 }
 0x1bc   :  { %v265_v37 = vadd.f32 %v260_v31, %v202_v35 }
 0x1be   :  { %v266_v38 = vmax.f32 %v265_v37, 0.0 }
 0x1c0   :  { %v267_v39 = vpack.c.bf16 %v266_v38, %v266_v38 }
 0x1c2   :  { %423 = vmatmul.mubr.msk.bf16.vlgmr.msra.gmra.mrb[8].mxu0 %vm291_vm4, %v267_v39 }
 0x295   :  { %v329_v41 = vpop.f32.mrb[8].mxu0 }
 0x296   :  { %v330_v42 = vadd.f32 %v366_v40, %v329_v41  ;;  %v424_v43 = vpop.f32.mrb[9].mxu0 }
 0x297   :  { %v332_v44 = vpop.f32.mrb[10].mxu0 }
 0x298   :  { %335 = vmax.xlane.f32.xlu0 %v330_v42  ;;  %v425_v45 = vpop.f32.mrb[11].mxu0 }
 0x325   :  { %v336_v46 = vpop.xlane.xlu0 %335 }
 0x326   :  { %v337_v47 = vsub.f32 %v330_v42, %v336_v46 }
 0x328   :  { %v338_v48 = vmul.f32 1.442695, %v337_v47 }
 0x32a   :  { %440 = vpow2.f32 %v338_v48 }
 0x334   :  { %v441_v49 = vpop.eup %440 }
 0x335   :  { %340 = vadd.xlane.f32.xlu0 %v441_v49 }
 0x3c2   :  { %v341_v50 = vpop.xlane.xlu0 %340 }
 0x3c3   :  { %442 = vlog2.f32 %v341_v50 }
 0x3cd   :  { %v443_v51 = vpop.eup %442 }
 0x3ce   :  { %v343_v52 = vmul.f32 0.6931472, %v443_v51 }
 0x3d0   :  { %v344_v53 = vsub.f32 %v337_v47, %v343_v52 }
 0x3d2   :  { %345 = vst [vmem:[%s583_s9] sm:$0xff] %v344_v53 }

</bundles_post_ra>
